<compile_context>
chip_gen: v7x
topology: tpu7x:2x2x1
jax: 0.10.0
libtpu: 0.0.40
codegen_flags: <defaults>
</compile_context>

<pallas_src>
import jax
import jax.numpy as jnp
from jax.experimental import pallas as pl
from jax.experimental.pallas import tpu as pltpu


def _round_up(x, m):
    return ((x + m - 1) // m) * m


def _vmem_budget_bytes():
    """Conservative per-kernel VMEM tile budget, derived from the device."""
    cap = 64 * 1024 * 1024  # assume the smallest (v7x per-TC) if query fails
    try:
        info = pltpu.get_tpu_info()
        cap = int(getattr(info, "vmem_capacity_bytes", cap))
    except Exception:
        pass
    return max(8 * 1024 * 1024, min(cap // 3, 40 * 1024 * 1024))


def _tile_vmem_bytes(tm, tk, H):
    """Double-buffered bf16 x/w tiles + bias + resident f32 output block."""
    return 4 * tm * tk + 4 * tk * H + 8 * H + 8 * tm * H


def _pick_tk(D_pad, H, tm, budget):
    """Largest K tile (multiple of 128, dividing D_pad) fitting the budget;
    prefers n_k == 1 (single streamed weight DMA per M tile)."""
    if _tile_vmem_bytes(tm, D_pad, H) <= budget:
        return D_pad
    best = 128
    for tk in range(128, D_pad, 128):
        if D_pad % tk == 0 and _tile_vmem_bytes(tm, tk, H) <= budget:
            best = tk
    return best


# ----------------------------------------------------------------------------
# Kernel 1: grouped fused Linear.
#   Grid = (M_tiles, K_tiles).  Each M tile belongs entirely to one problem
#   (obj-proj or rel-proj); a scalar-prefetched group id picks the weight/bias
#   slab in the index_map.  M is "parallel", K is last / "arbitrary".
#   The f32 output block is the resident accumulator, initialized with the
#   bias at k == 0 (no scratch, no final bias pass).
# ----------------------------------------------------------------------------
def _grouped_linear_kernel(group_ref, x_ref, w_ref, b_ref, o_ref):
    del group_ref  # only used by the index_maps
    k = pl.program_id(1)

    @pl.when(k == 0)
    def _():
        o_ref[...] = jnp.broadcast_to(b_ref[...], o_ref.shape).astype(o_ref.dtype)

    o_ref[...] += jnp.dot(
        x_ref[...], w_ref[...], preferred_element_type=jnp.float32
    )


def pallas_grouped_linear(x, w_stacked, b_stacked, group_ids, *, tm):
    """x: [Np, D_pad] bf16 (obj rows then rel rows, each padded to tm),
    w_stacked: [2, D_pad, H] bf16, b_stacked: [2, 1, H] f32,
    group_ids: [Np // tm] int32 (0 = obj weights, 1 = rel weights).
    Returns [Np, H] float32."""
    Np, D_pad = x.shape
    _, _, H = w_stacked.shape
    n_m = Np // tm
    assert group_ids.shape == (n_m,)

    budget = _vmem_budget_bytes()
    tk = _pick_tk(D_pad, H, tm, budget)
    n_k = D_pad // tk
    vmem_limit = int(min(48 * 1024 * 1024,
                         max(2 * _tile_vmem_bytes(tm, tk, H) + (2 << 20),
                             16 * 1024 * 1024)))

    return pl.pallas_call(
        _grouped_linear_kernel,
        out_shape=jax.ShapeDtypeStruct((Np, H), jnp.float32),
        grid_spec=pltpu.PrefetchScalarGridSpec(
            num_scalar_prefetch=1,
            grid=(n_m, n_k),
            in_specs=[
                pl.BlockSpec((tm, tk), lambda i, k, grp: (i, k)),
                pl.BlockSpec((pl.Squeezed(), tk, H),
                             lambda i, k, grp: (grp[i], k, 0)),
                pl.BlockSpec((pl.Squeezed(), 1, H),
                             lambda i, k, grp: (grp[i], 0, 0)),
            ],
            out_specs=pl.BlockSpec((tm, H), lambda i, k, grp: (i, 0)),
        ),
        compiler_params=pltpu.CompilerParams(
            dimension_semantics=("parallel", "arbitrary"),
            vmem_limit_bytes=vmem_limit,
        ),
    )(group_ids, x, w_stacked, b_stacked)


# ----------------------------------------------------------------------------
# Kernel 2: fused classification head on raw logits (row-tiled).
#   obj_preds  = argmax(logits[:, 1:]) + 1   (first-occurrence tie-break,
#                identical to argmax(softmax(logits)[:, 1:]) + 1)
#   obj_scores = softmax(logits)[row, obj_preds]
#              = exp(masked_max - row_max) / sum(exp(logits - row_max))
# ----------------------------------------------------------------------------
def _cls_head_kernel(logits_ref, pred_ref, score_ref):
    x = logits_ref[...].astype(jnp.float32)          # (tn, C)
    C = x.shape[-1]
    neg = jnp.finfo(jnp.float32).min

    row_max = jnp.max(x, axis=-1, keepdims=True)
    denom = jnp.sum(jnp.exp(x - row_max), axis=-1, keepdims=True)

    col = jax.lax.broadcasted_iota(jnp.int32, x.shape, 1)
    xm = jnp.where(col == 0, neg, x)                  # mask class 0
    masked_max = jnp.max(xm, axis=-1, keepdims=True)
    idx = jnp.where(xm == masked_max, col, jnp.int32(C))
    pred_ref[...] = jnp.min(idx, axis=-1, keepdims=True).astype(jnp.int32)
    score_ref[...] = (jnp.exp(masked_max - row_max) / denom).astype(score_ref.dtype)


def pallas_cls_head(obj_logits, *, row_tile=256):
    N, C = obj_logits.shape
    tn = min(_round_up(N, 8), row_tile)
    Np = _round_up(N, tn)
    if Np != N:
        obj_logits = jnp.pad(obj_logits, ((0, Np - N), (0, 0)))

    preds, scores = pl.pallas_call(
        _cls_head_kernel,
        out_shape=(
            jax.ShapeDtypeStruct((Np, 1), jnp.int32),
            jax.ShapeDtypeStruct((Np, 1), jnp.float32),
        ),
        grid_spec=pltpu.PrefetchScalarGridSpec(
            num_scalar_prefetch=0,
            grid=(Np // tn,),
            in_specs=[pl.BlockSpec((tn, C), lambda i: (i, 0))],
            out_specs=[
                pl.BlockSpec((tn, 1), lambda i: (i, 0)),
                pl.BlockSpec((tn, 1), lambda i: (i, 0)),
            ],
        ),
        compiler_params=pltpu.CompilerParams(
            dimension_semantics=("parallel",),
        ),
    )(obj_logits)
    return preds[:N, 0], scores[:N, 0]


# ----------------------------------------------------------------------------
# Parameter prep (model-load time, outside the hot path): stack obj/rel Linear
# weights as [2, D_pad, H] bf16 (x @ W layout), biases as [2, 1, H] f32.
# ----------------------------------------------------------------------------
def prepare_proj_params(w_obj, b_obj, w_rel, b_rel):
    D, H = w_obj.shape
    D_pad = _round_up(D, 128)
    w = jnp.stack([w_obj, w_rel], axis=0).astype(jnp.bfloat16)
    if D_pad != D:
        w = jnp.pad(w, ((0, 0), (0, D_pad - D), (0, 0)))
    b = jnp.stack([b_obj, b_rel], axis=0)[:, None, :].astype(jnp.float32)
    return w, b


# ----------------------------------------------------------------------------
# KERN reasoning head wrapper (sgcls / no-label path).
# ----------------------------------------------------------------------------
@jax.jit
def kern_rel_reason(obj_fmaps, obj_logits, vr, w_stacked, b_stacked):
    N_obj, D = obj_fmaps.shape
    N_rel, D2 = vr.shape
    assert D == D2, "module uses obj_dim == rel_dim"
    _, D_pad, H = w_stacked.shape

    # M tile: multiple of 16 (bf16 sublane packing), capped at 256.
    tm = max(16, min(256, _round_up(max(N_obj, N_rel), 16)))
    n_obj_pad = _round_up(N_obj, tm)
    n_rel_pad = _round_up(N_rel, tm)

    obj_p = jnp.pad(obj_fmaps.astype(jnp.bfloat16),
                    ((0, n_obj_pad - N_obj), (0, D_pad - D)))
    rel_p = jnp.pad(vr.astype(jnp.bfloat16),
                    ((0, n_rel_pad - N_rel), (0, D_pad - D)))
    x = jnp.concatenate([obj_p, rel_p], axis=0)        # [Np_total, D_pad] bf16

    group_ids = jnp.concatenate([
        jnp.zeros((n_obj_pad // tm,), jnp.int32),
        jnp.ones((n_rel_pad // tm,), jnp.int32),
    ])

    proj = pallas_grouped_linear(x, w_stacked, b_stacked, group_ids, tm=tm)
    obj_feat = proj[:N_obj]
    rel_feat = proj[n_obj_pad:n_obj_pad + N_rel]

    obj_preds, obj_scores = pallas_cls_head(obj_logits)

    # TODO(synk): GGNN graph propagation producing rel_dists requires external
    # graph_path/emb_path knowledge matrices; not reproduced here.
    return obj_logits, obj_preds, obj_scores, obj_feat, rel_feat


if __name__ == "__main__":
    # Small shapes consistent with the reasoning head.
    N_OBJ, N_REL = 8, 16
    OBJ_DIM = 512        # module default is 4096 (VGG); scaled down
    HIDDEN = 128         # module default 512; scaled down
    NUM_OBJ_CLS = 151

    key = jax.random.PRNGKey(0)
    k1, k2, k3, k4, k5, k6, k7 = jax.random.split(key, 7)

    obj_fmaps = jax.random.normal(k1, (N_OBJ, OBJ_DIM), jnp.float32)
    obj_logits = jax.random.normal(k2, (N_OBJ, NUM_OBJ_CLS), jnp.float32)
    vr = jax.random.normal(k3, (N_REL, OBJ_DIM), jnp.float32)

    # nn.Linear-style init (uniform +/- 1/sqrt(fan_in)), stored as [in, out].
    lim = 1.0 / (OBJ_DIM ** 0.5)
    w_obj = jax.random.uniform(k4, (OBJ_DIM, HIDDEN), jnp.float32, -lim, lim)
    b_obj = jax.random.uniform(k5, (HIDDEN,), jnp.float32, -lim, lim)
    w_rel = jax.random.uniform(k6, (OBJ_DIM, HIDDEN), jnp.float32, -lim, lim)
    b_rel = jax.random.uniform(k7, (HIDDEN,), jnp.float32, -lim, lim)

    # Weight layout prepared once at model-load time (outside the hot path).
    w_stacked, b_stacked = prepare_proj_params(w_obj, b_obj, w_rel, b_rel)

    outs = kern_rel_reason(obj_fmaps, obj_logits, vr, w_stacked, b_stacked)
    outs = jax.block_until_ready(outs)
    obj_logits_o, obj_preds, obj_scores, obj_feat, rel_feat = outs

    # Reference check against plain JAX (bf16 matmul with f32 accumulation,
    # matching the kernel's numerics).
    ref_obj_feat = jnp.dot(obj_fmaps.astype(jnp.bfloat16),
                           w_obj.astype(jnp.bfloat16),
                           preferred_element_type=jnp.float32) + b_obj
    ref_rel_feat = jnp.dot(vr.astype(jnp.bfloat16),
                           w_rel.astype(jnp.bfloat16),
                           preferred_element_type=jnp.float32) + b_rel
    ref_probs = jax.nn.softmax(obj_logits, axis=1)
    ref_preds = jnp.argmax(ref_probs[:, 1:], axis=1) + 1
    ref_scores = jnp.take_along_axis(ref_probs, ref_preds[:, None], 1)[:, 0]

    assert jnp.allclose(obj_feat, ref_obj_feat, atol=1e-2, rtol=1e-2)
    assert jnp.allclose(rel_feat, ref_rel_feat, atol=1e-2, rtol=1e-2)
    assert jnp.all(obj_preds == ref_preds)
    assert jnp.allclose(obj_scores, ref_scores, atol=1e-5)

    print("KERNEL_OK")
</pallas_src>

<mosaic_0001>
module attributes {stable_mosaic.version = 11 : i64} {
  func.func @_grouped_linear_kernel(%arg0: i32, %arg1: i32, %arg2: memref<2xi32, #tpu.memory_space<smem>>, %arg3: memref<16x512xbf16, #tpu.memory_space<vmem>>, %arg4: memref<1x512x128xbf16, #tpu.memory_space<vmem>>, %arg5: memref<1x1x128xf32, #tpu.memory_space<vmem>>, %arg6: memref<16x128xf32, #tpu.memory_space<vmem>>) attributes {dimension_semantics = [#tpu.dimension_semantics<parallel>, #tpu.dimension_semantics<arbitrary>], iteration_bounds = array<i64: 2, 1>, scalar_prefetch = 1 : i64, scratch_operands = 0 : i64, tpu.core_type = #tpu.core_type<tc>, window_params = [{transform_indices = @transform_0, window_bounds = array<i64: 16, 512>}, {transform_indices = @transform_1, window_bounds = array<i64: 1, 512, 128>}, {transform_indices = @transform_2, window_bounds = array<i64: 1, 1, 128>}, {transform_indices = @transform_3, window_bounds = array<i64: 16, 128>}]} {
    %c0_i32 = arith.constant 0 : i32
    %0 = arith.cmpi eq, %arg1, %c0_i32 : i32
    %1 = arith.extui %0 : i1 to i32
    %c0_i32_0 = arith.constant 0 : i32
    %2 = arith.cmpi ne, %1, %c0_i32_0 : i32
    scf.if %2 {
      %c0_9 = arith.constant 0 : index
      %c0_10 = arith.constant 0 : index
      %c0_11 = arith.constant 0 : index
      %10 = vector.load %arg5[%c0_9, %c0_10, %c0_11] : memref<1x1x128xf32, #tpu.memory_space<vmem>>, vector<1x1x128xf32>
      %11 = vector.shape_cast %10 : vector<1x1x128xf32> to vector<1x128xf32>
      %12 = vector.shape_cast %11 : vector<1x128xf32> to vector<1x128xf32>
      %13 = vector.broadcast %12 : vector<1x128xf32> to vector<16x128xf32>
      %c0_12 = arith.constant 0 : index
      %c0_13 = arith.constant 0 : index
      %14 = vector.load %arg6[%c0_12, %c0_13] : memref<16x128xf32, #tpu.memory_space<vmem>>, vector<16x128xf32>
      tpu.vector_store %arg6[%c0_12, %c0_13], %13 {strides = array<i32>} : memref<16x128xf32, #tpu.memory_space<vmem>>, vector<16x128xf32>,
    } else {
    }
    %c0 = arith.constant 0 : index
    %c0_1 = arith.constant 0 : index
    %3 = vector.load %arg6[%c0, %c0_1] : memref<16x128xf32, #tpu.memory_space<vmem>>, vector<16x128xf32>
    %c0_2 = arith.constant 0 : index
    %c0_3 = arith.constant 0 : index
    %4 = vector.load %arg3[%c0_2, %c0_3] : memref<16x512xbf16, #tpu.memory_space<vmem>>, vector<16x512xbf16>
    %c0_4 = arith.constant 0 : index
    %c0_5 = arith.constant 0 : index
    %c0_6 = arith.constant 0 : index
    %5 = vector.load %arg4[%c0_4, %c0_5, %c0_6] : memref<1x512x128xbf16, #tpu.memory_space<vmem>>, vector<1x512x128xbf16>
    %6 = vector.shape_cast %5 : vector<1x512x128xbf16> to vector<512x128xbf16>
    %cst = arith.constant dense<0.000000e+00> : vector<16x128xf32>
    %7 = tpu.matmul %4, %6, %cst {dimension_numbers = #tpu.dot_dimension_numbers<[1], [0], [0], [1], [0, 0, 1, 1], [], []>} : vector<16x512xbf16>, vector<512x128xbf16>, vector<16x128xf32> -> vector<16x128xf32>
    %8 = arith.addf %3, %7 : vector<16x128xf32>
    %c0_7 = arith.constant 0 : index
    %c0_8 = arith.constant 0 : index
    %9 = vector.load %arg6[%c0_7, %c0_8] : memref<16x128xf32, #tpu.memory_space<vmem>>, vector<16x128xf32>
    tpu.vector_store %arg6[%c0_7, %c0_8], %8 {strides = array<i32>} : memref<16x128xf32, #tpu.memory_space<vmem>>, vector<16x128xf32>,
    return
  }
  func.func @transform_0(%arg0: i32, %arg1: i32, %arg2: memref<2xi32, #tpu.memory_space<smem>>) -> (i32, i32) {
    %c0_i32 = arith.constant 0 : i32
    return %arg0, %arg1 : i32, i32
  }
  func.func @transform_1(%arg0: i32, %arg1: i32, %arg2: memref<2xi32, #tpu.memory_space<smem>>) -> (i32, i32, i32) {
    %0 = arith.index_cast %arg0 : i32 to index
    %1 = memref.load %arg2[%0] : memref<2xi32, #tpu.memory_space<smem>>
    %c0_i32 = arith.constant 0 : i32
    %c0_i32_0 = arith.constant 0 : i32
    return %1, %arg1, %c0_i32 : i32, i32, i32
  }
  func.func @transform_2(%arg0: i32, %arg1: i32, %arg2: memref<2xi32, #tpu.memory_space<smem>>) -> (i32, i32, i32) {
    %0 = arith.index_cast %arg0 : i32 to index
    %1 = memref.load %arg2[%0] : memref<2xi32, #tpu.memory_space<smem>>
    %c0_i32 = arith.constant 0 : i32
    %c0_i32_0 = arith.constant 0 : i32
    %c0_i32_1 = arith.constant 0 : i32
    return %1, %c0_i32, %c0_i32_0 : i32, i32, i32
  }
  func.func @transform_3(%arg0: i32, %arg1: i32, %arg2: memref<2xi32, #tpu.memory_space<smem>>) -> (i32, i32) {
    %c0_i32 = arith.constant 0 : i32
    %c0_i32_0 = arith.constant 0 : i32
    return %arg0, %c0_i32 : i32, i32
  }
}

module attributes {stable_mosaic.version = 11 : i64} {
  func.func @_cls_head_kernel(%arg0: i32, %arg1: memref<8x151xf32, #tpu.memory_space<vmem>>, %arg2: memref<8x1xi32, #tpu.memory_space<vmem>>, %arg3: memref<8x1xf32, #tpu.memory_space<vmem>>) attributes {dimension_semantics = [#tpu.dimension_semantics<parallel>], iteration_bounds = array<i64: 1>, scalar_prefetch = 0 : i64, scratch_operands = 0 : i64, tpu.core_type = #tpu.core_type<tc>, window_params = [{transform_indices = @transform_0, window_bounds = array<i64: 8, 151>}, {transform_indices = @transform_1, window_bounds = array<i64: 8, 1>}, {transform_indices = @transform_2, window_bounds = array<i64: 8, 1>}]} {
    %c0 = arith.constant 0 : index
    %c0_0 = arith.constant 0 : index
    %0 = vector.load %arg1[%c0, %c0_0] : memref<8x151xf32, #tpu.memory_space<vmem>>, vector<8x151xf32>
    %cst = arith.constant dense<0xFF800000> : vector<8xf32>
    %1 = vector.multi_reduction <maximumf>, %0, %cst [1] : vector<8x151xf32> to vector<8xf32>
    %2 = vector.shape_cast %1 : vector<8xf32> to vector<8x1xf32>
    %3 = vector.broadcast %2 : vector<8x1xf32> to vector<8x151xf32>
    %4 = arith.subf %0, %3 : vector<8x151xf32>
    %5 = math.exp %4 : vector<8x151xf32>
    %cst_1 = arith.constant dense<0.000000e+00> : vector<8xf32>
    %6 = vector.multi_reduction <add>, %5, %cst_1 [1] : vector<8x151xf32> to vector<8xf32>
    %7 = vector.shape_cast %6 : vector<8xf32> to vector<8x1xf32>
    %8 = tpu.iota {dimensions = array<i32: 1>} : vector<8x151xi32>
    %c0_i32 = arith.constant 0 : i32
    %9 = vector.broadcast %c0_i32 : i32 to vector<8x151xi32>
    %10 = arith.cmpi eq, %8, %9 : vector<8x151xi32>
    %cst_2 = arith.constant -3.40282347E+38 : f32
    %11 = vector.broadcast %cst_2 : f32 to vector<8x151xf32>
    %12 = arith.select %10, %11, %0 : vector<8x151xi1>, vector<8x151xf32>
    %cst_3 = arith.constant dense<0xFF800000> : vector<8xf32>
    %13 = vector.multi_reduction <maximumf>, %12, %cst_3 [1] : vector<8x151xf32> to vector<8xf32>
    %14 = vector.shape_cast %13 : vector<8xf32> to vector<8x1xf32>
    %15 = vector.broadcast %14 : vector<8x1xf32> to vector<8x151xf32>
    %16 = arith.cmpf oeq, %12, %15 : vector<8x151xf32>
    %c151_i32 = arith.constant 151 : i32
    %17 = vector.broadcast %c151_i32 : i32 to vector<8x151xi32>
    %18 = arith.select %16, %8, %17 : vector<8x151xi1>, vector<8x151xi32>
    %cst_4 = arith.constant dense<2147483647> : vector<8xi32>
    %19 = vector.multi_reduction <minsi>, %18, %cst_4 [1] : vector<8x151xi32> to vector<8xi32>
    %20 = vector.shape_cast %19 : vector<8xi32> to vector<8x1xi32>
    %c0_5 = arith.constant 0 : index
    %c0_6 = arith.constant 0 : index
    %21 = vector.load %arg2[%c0_5, %c0_6] : memref<8x1xi32, #tpu.memory_space<vmem>>, vector<8x1xi32>
    tpu.vector_store %arg2[%c0_5, %c0_6], %20 {strides = array<i32>} : memref<8x1xi32, #tpu.memory_space<vmem>>, vector<8x1xi32>,
    %22 = arith.subf %14, %2 : vector<8x1xf32>
    %23 = math.exp %22 : vector<8x1xf32>
    %24 = arith.divf %23, %7 : vector<8x1xf32>
    %c0_7 = arith.constant 0 : index
    %c0_8 = arith.constant 0 : index
    %25 = vector.load %arg3[%c0_7, %c0_8] : memref<8x1xf32, #tpu.memory_space<vmem>>, vector<8x1xf32>
    tpu.vector_store %arg3[%c0_7, %c0_8], %24 {strides = array<i32>} : memref<8x1xf32, #tpu.memory_space<vmem>>, vector<8x1xf32>,
    return
  }
  func.func @transform_0(%arg0: i32) -> (i32, i32) {
    %c0_i32 = arith.constant 0 : i32
    %c0_i32_0 = arith.constant 0 : i32
    return %arg0, %c0_i32 : i32, i32
  }
  func.func @transform_1(%arg0: i32) -> (i32, i32) {
    %c0_i32 = arith.constant 0 : i32
    %c0_i32_0 = arith.constant 0 : i32
    return %arg0, %c0_i32 : i32, i32
  }
  func.func @transform_2(%arg0: i32) -> (i32, i32) {
    %c0_i32 = arith.constant 0 : i32
    %c0_i32_0 = arith.constant 0 : i32
    return %arg0, %c0_i32 : i32, i32
  }
}

</mosaic_0001>

<bundles_post_ra>
// kernel: kern_rel_reason.3
= control target key start
LH: loop header
LB: loop body
LE: loop exit
PB: predicated region body
PF: predicated region fallthrough
CT: control target
= control target key end

     0   :  { %vm12_vm0 = vcmask 187392   ;;  %v27_v0 = vlaneseq  ;;  %vm59_vm6 = vcmask 7168   ;;  %s113_s0 = inlined_call_operand.vmem [shape: f32[8,151], index: 0, kind: input, shape index: {}]   ;;  %s114_s2 = inlined_call_operand.vmem [shape: f32[8,1], index: 2, kind: output, shape index: {1}]   ;;  %s115_s1 = inlined_call_operand.vmem [shape: s32[8,1], index: 1, kind: output, shape index: {0}]  }
   0x1   :  { %v11_v1 = vld [vmem:[%s113_s0 + $0x8] sm:$0xff]  ;;  %v10_v2 = vld [vmem:[%s113_s0] sm:$0xff] }
   0x2   :  { %v28_v3 = vand.u32 127, %v27_v0  ;;  %v13_v4 = vsel %vm12_vm0, %v11_v1, -inf }
   0x3   :  { %v14_v7 = vmax.f32 %v10_v2, %v13_v4 }
   0x4   :  { %vm30_vm1 = vcmp.eq.s32.totalorder %v28_v3, 0  ;;  %v29_v8 = vadd.s32 128, %v28_v3 }
   0x5   :  { %v32_v5 = vsel %vm30_vm1, -3.4028235e+38, %v10_v2 }
   0x6   :  { %v35_v6 = vmax.f32 %v32_v5, %v13_v4 }
   0x8   :  { %36 = vmax.xlane.f32.xlu0 %v35_v6 }
   0xc   :  { %15 = vmax.xlane.f32.xlu0 %v14_v7 }
  0x95   :  { %v37_v9 = vpop.xlane.xlu0 %36 }
  0x96   :  { %vm38_vm2 = vcmp.eq.f32.partialorder %v32_v5, %v37_v9  ;;  %vm39_vm3 = vcmp.eq.f32.partialorder %v11_v1, %v37_v9 }
  0x97   :  { %v40_v10 = vsel %vm38_vm2, %v28_v3, 151  ;;  %v41_v11 = vsel %vm39_vm3, %v29_v8, 151 }
  0x98   :  { %v42_v12 = vsel %vm12_vm0, %v41_v11, 2147483647 }
  0x99   :  { %v16_v13 = vpop.xlane.xlu0 %15  ;;  %vm43_vm4 = vcmp.lt.s32.totalorder %v40_v10, %v42_v12 }
  0x9a   :  { %v17_v14 = vsub.f32 %v10_v2, %v16_v13  ;;  %v18_v15 = vsub.f32 %v11_v1, %v16_v13  ;;  %v44_v16 = vsel %vm43_vm4, %v40_v10, %v42_v12  ;;  %v61_v29 = vsub.f32 %v37_v9, %v16_v13 }
  0x9b   :  { %v46_v17 = vshra.s32 %v44_v16, 16  ;;  %v45_v25 = vand.u32 65535, %v44_v16 }
  0x9c   :  { %v19_v18 = vmul.f32 1.442695, %v17_v14  ;;  %v21_v19 = vmul.f32 1.442695, %v18_v15  ;;  %v62_v30 = vmul.f32 1.442695, %v61_v29 }
  0x9d   :  { %v48_v20 = vcvt.s32.f32 %v46_v17  ;;  %v47_v27 = vcvt.s32.f32 %v45_v25 }
  0x9e   :  { %75 = vpow2.f32 %v19_v18 }
  0x9f   :  { %77 = vpow2.f32 %v21_v19  ;;  %49 = vmin.xlane.f32.xlu1 %v48_v20 }
  0xa0   :  { %79 = vpow2.f32 %v62_v30 }
  0xa8   :  { %v76_v21 = vpop.eup %75 }
  0xa9   :  { %v78_v22 = vpop.eup %77 }
  0xaa   :  { %v23_v23 = vsel %vm12_vm0, %v78_v22, 0.0  ;;  %v80_v32 = vpop.eup %79 }
  0xab   :  { %v24_v24 = vadd.f32 %v76_v21, %v23_v23 }
  0xad   :  { %25 = vadd.xlane.f32.xlu1 %v24_v24 }
 0x12c   :  { %v50_v26 = vpop.xlane.xlu1 %49 }
 0x12d   :  { %vm51_vm5 = vcmp.eq.f32.partialorder %v48_v20, %v50_v26  ;;  %v56_v35 = vcvt.f32.s32 %v50_v26 }
 0x12e   :  { %v52_v28 = vsel %vm51_vm5, %v47_v27, inf }
 0x12f   :  { %53 = vmin.xlane.f32.xlu0 %v52_v28  ;;  %v57_v37 = vshll.u32 %v56_v35, 16 }
 0x13a   :  { %v26_v31 = vpop.xlane.xlu1 %25 }
 0x13b   :  { %81 = vrcp.f32 %v26_v31 }
 0x145   :  { %v82_v33 = vpop.eup %81 }
 0x146   :  { %v65_v34 = vmul.f32 %v82_v33, %v80_v32 }
 0x148   :  { %66 = vst.msk [vmem:[%s114_s2] sm:$0xff] %vm59_vm6, %v65_v34 }
 0x1bc   :  { %v54_v36 = vpop.xlane.xlu0 %53 }
 0x1bd   :  { %v55_v38 = vcvt.f32.s32 %v54_v36 }
 0x1bf   :  { %v58_v39 = vadd.s32 %v57_v37, %v55_v38 }
 0x1c1   :  { %60 = vst.msk [vmem:[%s115_s1] sm:$0xff] %vm59_vm6, %v58_v39 }

// kernel: kern_rel_reason.2
= control target key start
LH: loop header
LB: loop body
LE: loop exit
PB: predicated region body
PF: predicated region fallthrough
CT: control target
= control target key end

     0   :  { %s1268_s0 = inlined_call_operand.vmem [shape: s32[2], index: 0, kind: input, shape index: {}]   ;;  %s1269_s1 = inlined_call_operand.vmem [shape: bf16[32,512], index: 1, kind: input, shape index: {}]   ;;  %s1270_s2 = inlined_call_operand.hbm [shape: bf16[2,512,128], index: 2, kind: input, shape index: {}]   ;;  %s1271_s3 = inlined_call_operand.vmem [shape: f32[2,1,128], index: 3, kind: input, shape index: {}]   ;;  %s1272_s4 = inlined_call_operand.vmem [shape: f32[32,128], index: 4, kind: output, shape index: {}]  }
   0x1   :  { %s9_s17 = sshll.u32 %s1268_s0, 4  ;;  %s10_s17 = int_to_ptr.vmem [resolvable:$true] %s9_s17 }
   0x2   :  { %s969_s18 = scalar_lea.vmem %s10_s17, 16  ;;  %p974_p1 = scmp.lt.s32.totalorder %s10_s17, %s10_s17 }
   0x3   :  { %p970_p0 = scmp.ne.s32.totalorder %s10_s17, %s969_s18  ;;  %p975_p2 = scmp.lt.s32.totalorder %s969_s18, %s969_s18 }
   0x5   :  { %p976_p3 = por %p975_p2, %p974_p1 }
   0x7   :  { %p977_p4 = pnand %p976_p3, %p970_p0 }
   0x9   :  { %980 = shalt.err (!%p977_p4)  }
   0xa   :  { %s1065_s19 = smov [#allocation3]  }
   0xb   :  { %12 = dma.vmem_to_smem %s10_s17, 16, %s1065_s19, [#allocation2] }
   0xc   :  { %1035 = dma.done.wait [#allocation2], 16 }
   0xd   :  { %1036 = vsyncadd [#allocation2], 4294967280 }
   0xe   :  { %14 = sfence }
   0xf   :  { %15 = vsyncpa [#allocation5], 0 }
  0x10   :  { %17 = vsyncpa [#allocation5 + $0x1], 0  ;;  %s1097_s20 = smov 0   ;;  %s1099_s21 = smov 0  }
  0x11   :  { %s1101_s0 = smov 0   ;;  %s1103_s22 = smov 0  }
  0x12   :  { %s1105_s23 = smov 0   ;;  %s1107_s24 = smov 0  }
  0x13 LB: > { %s35_s25 = sadd.s32 1, %s1059_s23  ;;  %s770_s26 = sadd.s32 4294967295, %s1063_s24   ;;  %s1063_s24 = sphi %s1107_s24, %s23_s24   ;;  %s1059_s23 = sphi %s1105_s23, %s1282_s23   ;;  %s1055_s22 = sphi %s1103_s22, %s1281_s22   ;;  %s1051_s0 = sphi %s1101_s0, %s1280_s0   ;;  %s1047_s21 = sphi %s1099_s21, %s1279_s21   ;;  %s1043_s20 = sphi %s1097_s20, %s1278_s20  }
  0x14   : > { %p37_p5 = scmp.ge.s32.totalorder %s35_s25, 2  ;;  %s67_s27 = sld [smem:[#allocation3 + %s1059_s23]] }
  0x15   : > { %p81_p6 = scmp.ne.s32.totalorder %s1051_s0, %s1047_s21  ;;  %p82_p7 = scmp.eq.s32.totalorder %s1063_s24, 0 }
  0x16   : > { %s1284_s25 = smov (%p37_p5, %s35_s25), 0  ;;  %p87_p8 = scmp.ne.s32.totalorder %s1047_s21, %s1043_s20 }
  0x17   : > { %s68_s28 = sld [smem:[#allocation3 + %s1284_s25]]  ;;  %p88_p9 = scmp.eq.s32.totalorder %s770_s26, 0 }
  0x18   : > { %s180_s30 = sand.u32 1, %s1051_s0   ;;  %p83_p11 = por %p82_p7, %p81_p6 }
  0x19   : > { %p1135_p10 = por %p88_p9, %p87_p8  ;;  %s74_s5 = sadd.s32 1, %s1051_s0 }
  0x1a   : > { %p879_p12 = scmp.lt.s32.totalorder %s1063_s24, 2  ;;  %s774_s7 = sshll.u32 %s180_s30, 8 }
  0x1b   : > { %s1274_s29 = scalar_select %p1135_p10, 1, 0 }
  0x1c   : > { %p1142_p0 = pnand %p879_p12, %p83_p11  ;;  %p777_p1 = scmp.ge.s32.totalorder %s1063_s24, 1 }
  0x1d   : > { %s69_s6 = ssub.s32 %s67_s27, %s68_s28  ;;  %p210_p2 = scmp.lt.s32.totalorder %s1063_s24, 3 }
  0x1e   : > { %p72_p13 = scmp.eq.s32.totalorder %s69_s6, 0  ;;  %s184_s13 = scalar_lea.vmem [#allocation4], %s774_s7 }
  0x1f   : > { %s869_s9 = scalar_select %p83_p11, [#allocation3], [#allocation6] }
  0x20   : > { %s1147_s10 = scalar_select %p72_p13, %s1051_s0, %s74_s5  }
  0x21   : > { %s870_s11 = scalar_select %p83_p11, %s1059_s23, 0 }
  0x22   : > { %s1286_s9 = smov (!%p879_p12, %s869_s9), [#allocation7]  ;;  %s194_s14 = sshll.u32 %s184_s13, 4  ;;  %s1156_s14 = int_to_ptr.vmem [resolvable:$true] %s194_s14 }
  0x23   : > { %s1288_s11 = smov (!%p879_p12, %s870_s11), 0  ;;  %p1152_p3 = pnand %p777_p1, %p210_p2 }
  0x24   : > { %s185_s12 = sld [smem:[%s1286_s9 + %s1288_s11]]  ;;  %s1163_s20 = scalar_lea.sflag [#allocation5], %s180_s30 }
  0x25   : > { %p983_p5 = pneg %p1142_p0  ;;  %s986_s5 = scalar_lea.hbm %s1270_s2, 8192 }
  0x2a   : > { %s823_s16 = sshll.u32 %s185_s12, 12 }
  0x2b   : > { %s1161_s19 = scalar_lea.hbm %s1270_s2, %s823_s16 }
  0x2c   : > { %s981_s26 = scalar_lea.hbm %s1161_s19, 4096  ;;  %p987_p8 = scmp.lt.u32.totalorder %s1161_s19, %s1270_s2 }
  0x2d   : > { %p982_p4 = scmp.ne.s32.totalorder %s1161_s19, %s981_s26  ;;  %p988_p9 = scmp.lt.u32.totalorder %s986_s5, %s981_s26 }
  0x2e   : > { %p990_p12 = scmp.lt.u32.totalorder %s981_s26, %s1161_s19 }
  0x2f   : > { %p984_p6 = pnand %p983_p5, %p982_p4  ;;  %p989_p11 = por %p988_p9, %p987_p8 }
  0x31   : > { %p985_p7 = pneg %p984_p6  ;;  %p991_p13 = por %p990_p12, %p989_p11 }
  0x33   : > { %p992_p1 = pnand %p991_p13, %p985_p7 }
  0x35   : > { %995 = shalt.err (!%p992_p1)
}
  0x36   : > { %s996_s30 = scalar_lea.vmem %s1156_s14, 4096  ;;  %s1066_s9 = smov [#allocation4]  }
  0x37   : > { %p997_p2 = scmp.ne.s32.totalorder %s1156_s14, %s996_s30  ;;  %s1001_s11 = sshll.u32 %s1066_s9, 4  ;;  %s1002_s11 = int_to_ptr.vmem [resolvable:$false] %s1001_s11 }
  0x38   : > { %s1003_s12 = scalar_lea.vmem %s1002_s11, 8192  ;;  %p1004_p10 = scmp.lt.s32.totalorder %s1156_s14, %s1002_s11 }
  0x39   : > { %p999_p4 = pnand %p997_p2, %p983_p5  ;;  %p1005_p8 = scmp.lt.s32.totalorder %s1003_s12, %s996_s30 }
  0x3b   : > { %p1000_p6 = pneg %p999_p4  ;;  %p1006_p9 = por %p1005_p8, %p1004_p10 }
  0x3d   : > { %p1007_p11 = pnand %p1006_p9, %p1000_p6 }
  0x3f   : > { %1010 = shalt.err (!%p1007_p11)
}
  0x40   : > { %s1067_s13 = smov 64   ;;  %s1068_s16 = smov 4  }
  0x41   : > { %878 = dma.hbm_to_vmem [thread:$0]  (!%p1142_p0), %s1161_s19, 4096, %s1156_s14, %s1163_s20, %s1067_s13, %s1067_s13, %s1068_s16  }
  0x42   : > { %214 = sbr.rel (%p1152_p3) target bundleno = 331 (0x14b), region = 32  ;;  %s216_s17 = sand.u32 (!%p1152_p3), 1, %s1047_s21  }
  0x43   : > { %s778_s18 = sshll.u32 (!%p1152_p3), %s216_s17, 8  ;;  %s217_s26 = scalar_lea.sflag (!%p1152_p3), [#allocation5], %s216_s17 }
  0x44   : > { %s1194_s27 = scalar_lea.vmem (!%p1152_p3), [#allocation4], %s778_s18  ;;  %p1277_p10 = scmp.ne.s32.totalorder (!%p1152_p3), %s1274_s29, 0 }
  0x49   : > { %1038 = dma.done.wait (%p1277_p10), %s217_s26, 4096  }
  0x4a   : > { %1040 = vsyncadd (%p1277_p10), %s217_s26, 4294963200  ;;  %v931_v0 = vld [vmem:[%s1194_s27 + $0x40] sm:$0xff]   ;;  %v935_v4 = vld [vmem:[%s1194_s27 + $0x48] sm:$0xff]   ;;  %s271_s29 = sld [smem:[#allocation3 + %s1055_s22]]  ;;  %s779_s8 = sshll.u32 %s1055_s22, 1 }
  0x4b   : > { %v932_v1 = vld [vmem:[%s1194_s27 + $0xc0] sm:$0xff]   ;;  %825 = vmatprep.subr.bf16.mxu0 %v931_v0  ;;  %v936_v5 = vld [vmem:[%s1194_s27 + $0xc8] sm:$0xff]   ;;  %v939_v8 = vld [vmem:[%s1194_s27 + $0x50] sm:$0xff]   ;;  %p259_p0 = scmp.lt.s32.totalorder %s779_s8, 3 }
  0x4c   : > { %v933_v2 = vld [vmem:[%s1194_s27] sm:$0xff]   ;;  %847 = vmatprep.subr.bf16.mxu1 %v932_v1  ;;  %v937_v6 = vld [vmem:[%s1194_s27 + $0x8] sm:$0xff]   ;;  %v940_v9 = vld [vmem:[%s1194_s27 + $0xd0] sm:$0xff]  }
  0x4d   : > { %v934_v3 = vld [vmem:[%s1194_s27 + $0x80] sm:$0xff]   ;;  %826 = vmatpush3.bf16.msra.mxu0 %v933_v2  ;;  %v938_v7 = vld [vmem:[%s1194_s27 + $0x88] sm:$0xff]   ;;  %v941_v10 = vld [vmem:[%s1194_s27 + $0x10] sm:$0xff]   ;;  %s1290_s8 = smov (!%p259_p0, %s779_s8), 3 }
  0x4e   : > { %848 = vmatpush3.bf16.msra.mxu1 %v934_v3  ;;  %827 = vmatprep.subr.bf16.mxu0 %v935_v4  ;;  %v942_v11 = vld [vmem:[%s1194_s27 + $0x90] sm:$0xff]   ;;  %v943_v12 = vld [vmem:[%s1194_s27 + $0x58] sm:$0xff]   ;;  %v947_v16 = vld [vmem:[%s1194_s27 + $0x60] sm:$0xff]   ;;  %s824_s22 = sshll.u32 %s1290_s8, 4  ;;  %s783_s14 = sshll.u32 %s1290_s8, 3 }
  0x4f   : > { %849 = vmatprep.subr.bf16.mxu1 %v936_v5  ;;  %v944_v13 = vld [vmem:[%s1194_s27 + $0xd8] sm:$0xff]   ;;  %v948_v17 = vld [vmem:[%s1194_s27 + $0xe0] sm:$0xff]   ;;  %v951_v20 = vld [vmem:[%s1194_s27 + $0x68] sm:$0xff]   ;;  %s266_s6 = scalar_lea.vmem %s1269_s1, %s824_s22  ;;  %s1242_s9 = scalar_lea.vmem %s1272_s4, %s783_s14 }
  0x50   : > { %v945_v14 = vld [vmem:[%s1194_s27 + $0x18] sm:$0xff]   ;;  %v949_v18 = vld [vmem:[%s1194_s27 + $0x20] sm:$0xff]   ;;  %v952_v21 = vld [vmem:[%s1194_s27 + $0xe8] sm:$0xff]   ;;  %p272_p3 = scmp.lt.s32.totalorder %s271_s29, 1 }
  0x51   : > { %828 = vmatpush3.bf16.msra.mxu0 %v937_v6  ;;  %v946_v15 = vld [vmem:[%s1194_s27 + $0x98] sm:$0xff]   ;;  %v950_v19 = vld [vmem:[%s1194_s27 + $0xa0] sm:$0xff]   ;;  %v953_v22 = vld [vmem:[%s1194_s27 + $0x28] sm:$0xff]  }
  0x52   : > { %850 = vmatpush3.bf16.msra.mxu1 %v938_v7  ;;  %829 = vmatprep.subr.bf16.mxu0 %v939_v8  ;;  %v954_v23 = vld [vmem:[%s1194_s27 + $0xa8] sm:$0xff]   ;;  %v955_v24 = vld [vmem:[%s1194_s27 + $0x70] sm:$0xff]   ;;  %s1292_s29 = smov (!%p272_p3, %s271_s29), 1  ;;  %v959_v28 = vld [vmem:[%s1194_s27 + $0x78] sm:$0xff]  }
  0x53   : > { %851 = vmatprep.subr.bf16.mxu1 %v940_v9  ;;  %v956_v25 = vld [vmem:[%s1194_s27 + $0xf0] sm:$0xff]   ;;  %v960_v29 = vld [vmem:[%s1194_s27 + $0xf8] sm:$0xff]   ;;  %s274_s20 = scalar_lea.vmem %s1271_s3, %s1292_s29 }
  0x54   : > { %v957_v26 = vld [vmem:[%s1194_s27 + $0x30] sm:$0xff]   ;;  %v961_v30 = vld [vmem:[%s1194_s27 + $0x38] sm:$0xff]   ;;  %v784_v32 = vld [vmem:[%s274_s20] ss:$0 sm:$0xff] }
  0x55   : > { %830 = vmatpush3.bf16.msra.mxu0 %v941_v10  ;;  %v958_v27 = vld [vmem:[%s1194_s27 + $0xb0] sm:$0xff]   ;;  %v962_v31 = vld [vmem:[%s1194_s27 + $0xb8] sm:$0xff]   ;;  %294 = vst [vmem:[%s1242_s9] sm:$0xff] %v784_v32  ;;  %295 = vst [vmem:[%s1242_s9 + $0x8] sm:$0xff] %v784_v32 }
  0x56   : > { %852 = vmatpush3.bf16.msra.mxu1 %v942_v11  ;;  %831 = vmatprep.subr.bf16.mxu0 %v943_v12  ;;  %v963_v33 = vld [vmem:[%s266_s6] ss:$16 sps:$4 sm:$0xff]   ;;  %v965_v34 = vld [vmem:[%s266_s6 + $0x4] ss:$16 sps:$4 sm:$0xff]   ;;  %v966_v35 = vld [vmem:[%s266_s6 + $0x8] ss:$16 sps:$4 sm:$0xff]  }
  0x57   : > { %853 = vmatprep.subr.bf16.mxu1 %v944_v13  ;;  %v968_v36 = vld [vmem:[%s266_s6 + $0xc] ss:$16 sps:$4 sm:$0xff]   ;;  %610 = vmatprep.mubr.bf16.mxu0 %v965_v34 }
  0x58   : > { %651 = vmatprep.mubr.bf16.mxu1 %v968_v36 }
  0x59   : > { %832 = vmatpush3.bf16.msra.mxu0 %v945_v14 }
  0x5a   : > { %854 = vmatpush3.bf16.msra.mxu1 %v946_v15  ;;  %833 = vmatprep.subr.bf16.mxu0 %v947_v16 }
  0x5b   : > { %855 = vmatprep.subr.bf16.mxu1 %v948_v17 }
  0x5c   : > { %v296_v46 = vld [vmem:[%s1242_s9] sm:$0xff] }
  0x5d   : > { %834 = vmatpush3.bf16.msra.mxu0 %v949_v18 }
  0x5e   : > { %856 = vmatpush3.bf16.msra.mxu1 %v950_v19  ;;  %835 = vmatprep.subr.bf16.mxu0 %v951_v20 }
  0x5f   : > { %857 = vmatprep.subr.bf16.mxu1 %v952_v21 }
  0x61   : > { %836 = vmatpush3.bf16.msra.mxu0 %v953_v22 }
  0x62   : > { %858 = vmatpush3.bf16.msra.mxu1 %v954_v23  ;;  %837 = vmatprep.subr.bf16.mxu0 %v955_v24 }
  0x63   : > { %859 = vmatprep.subr.bf16.mxu1 %v956_v25 }
  0x65   : > { %838 = vmatpush3.bf16.msra.mxu0 %v957_v26 }
  0x66   : > { %860 = vmatpush3.bf16.msra.mxu1 %v958_v27  ;;  %839 = vmatprep.subr.bf16.mxu0 %v959_v28 }
  0x67   : > { %861 = vmatprep.subr.bf16.mxu1 %v960_v29 }
  0x69   : > { %840 = vmatpush3.bf16.msra.mxu0 %v961_v30 }
  0x6a   : > { %862 = vmatpush3.bf16.msra.mxu1 %v962_v31 }
  0x6c   : > { %611 = vmatmul.mubr.bf16.vlgmr.msra.gmra.mrb[0].mxu0 %v963_v33 }
  0x6d   : > { %652 = vmatmul.mubr.bf16.vlgmr.msra.gmra.mrb[0].mxu1 %v966_v35 }
 0x13f   : > { %v841_v37 = vpop.f32.mrb[0].mxu0 }
 0x140   : > { %v863_v38 = vpop.f32.mrb[0].mxu1  ;;  %v842_v39 = vpop.f32.mrb[1].mxu0 }
 0x141   : > { %v843_v40 = vadd.f32 %v842_v39, %v841_v37  ;;  %v864_v41 = vpop.f32.mrb[1].mxu1  ;;  %v844_v42 = vpop.f32.mrb[2].mxu0 }
 0x142   : > { %v865_v43 = vadd.f32 %v864_v41, %v863_v38  ;;  %v866_v44 = vpop.f32.mrb[2].mxu1  ;;  %v845_v45 = vpop.f32.mrb[3].mxu0 }
 0x143   : > { %v846_v47 = vadd.f32 %v845_v45, %v844_v42  ;;  %v867_v48 = vpop.f32.mrb[3].mxu1 }
 0x144   : > { %v654_v49 = vadd.f32 %v865_v43, %v843_v40  ;;  %v868_v50 = vadd.f32 %v867_v48, %v866_v44 }
 0x146   : > { %v660_v51 = vadd.f32 %v654_v49, %v296_v46  ;;  %v657_v52 = vadd.f32 %v868_v50, %v846_v47 }
 0x148   : > { %v661_v53 = vadd.f32 %v784_v32, %v657_v52  ;;  %662 = vst [vmem:[%s1242_s9] sm:$0xff] %v660_v51 }
 0x14a   : > { %663 = vst [vmem:[%s1242_s9 + $0x8] sm:$0xff] %v661_v53 }
 0x14b PF: > { %s23_s24 = sadd.s32 1, %s1063_s24   ;;  %s1278_s20 = smov %s1047_s21 }
 0x14c   : > { %p20_p5 = scmp.ge.s32.totalorder %s23_s24, 4   ;;  %s1279_s21 = smov %s1051_s0 }
 0x14d   : > { %s1280_s0 = smov %s1147_s10  ;;  %s1281_s22 = smov %s1059_s23 }
 0x14e   : > { %s1282_s23 = smov %s1284_s25  ;;  %22 = sbr.rel (!%p20_p5) target bundleno = 19 (0x13), region = 82 }
 0x155   :  { %686 = vsyncpa [#allocation5], 1 }
 0x156   :  { %688 = vsyncpa [#allocation5 + $0x1], 1 }

</bundles_post_ra>
